<compile_context>
chip_gen: v5e
topology: v5e:2x2
jax: 0.10.0
libtpu: 0.0.40
codegen_flags: <defaults>
</compile_context>

<pallas_src>
import functools

import jax
import jax.numpy as jnp
from jax import lax
from jax.experimental import pallas as pl
from jax.experimental.pallas import tpu as pltpu

D_IN, D_HID, D_OUT = 20, 15, 10


def _mlp_l1_kernel(xT_ref, tT_ref, w1t_ref, b1_ref, w2t_ref, b2_ref,
                   partial_ref, acc_ref, *, batch, ntpc, tm):
    c = pl.program_id(0)   # core-parallel slice of the batch
    i = pl.program_id(1)   # reduction step within the slice

    @pl.when(i == 0)
    def _init():
        acc_ref[...] = jnp.zeros_like(acc_ref)

    x = xT_ref[...]                                                    # (D_IN, tm) f32
    # y^T = w2^T @ relu(w1^T @ x^T + b1) + b2 ; biases are (D,1) columns -> broadcast over lanes
    h = jnp.maximum(
        jnp.dot(w1t_ref[...], x, preferred_element_type=jnp.float32) + b1_ref[...], 0.0)
    y = jnp.dot(w2t_ref[...], h, preferred_element_type=jnp.float32) + b2_ref[...]
    diff = jnp.abs(y - tT_ref[...])                                    # (D_OUT, tm)

    # Mask padded batch columns (global column index >= true batch size).
    col0 = (c * ntpc + i) * tm
    cols = lax.broadcasted_iota(jnp.int32, (1, tm), 1) + col0
    diff = jnp.where(cols < batch, diff, 0.0)

    acc_ref[...] += jnp.sum(diff, axis=1, keepdims=True)               # (D_OUT, 1)

    @pl.when(i == pl.num_programs(1) - 1)
    def _finalize():
        total = jnp.sum(acc_ref[...])
        # Splat the per-core partial sum across this core's (8,128) output tile
        # (keeps the output block fully (8,128)-aligned and lane-dense).
        partial_ref[...] = jnp.zeros(partial_ref.shape, jnp.float32) + total


def model_with_l1_loss(xT, tT, w1t, b1, w2t, b2, *, tm=4096, num_core_splits=2):
    """Feature-major inputs: xT (20, B), tT (10, B); w1t (15,20), b1 (15,), w2t (10,15), b2 (10,).

    Returns the scalar f32 L1 loss mean(|model(x) - t|).
    """
    assert xT.shape[0] == D_IN and tT.shape[0] == D_OUT
    B = xT.shape[1]
    assert tT.shape[1] == B

    # Lane-dense batch tile: multiple of 128, no bigger than the (rounded-up) batch.
    tm = int(max(128, min(tm, 128 * pl.cdiv(B, 128))))
    nt_total = pl.cdiv(B, tm)
    nc = int(max(1, min(num_core_splits, nt_total)))   # batch split across TensorCores
    ntpc = pl.cdiv(nt_total, nc)                       # tiles per core
    b_pad = nc * ntpc * tm

    if b_pad != B:
        # NOTE: ideally the producer emits already-padded data; the padded tail is masked
        # in-kernel so it never contributes to the loss.
        xT = jnp.pad(xT, ((0, 0), (0, b_pad - B)))
        tT = jnp.pad(tT, ((0, 0), (0, b_pad - B)))

    b1c = b1.reshape(D_HID, 1).astype(jnp.float32)
    b2c = b2.reshape(D_OUT, 1).astype(jnp.float32)
    w1t = w1t.astype(jnp.float32)
    w2t = w2t.astype(jnp.float32)

    kernel = functools.partial(_mlp_l1_kernel, batch=B, ntpc=ntpc, tm=tm)

    flops = 2 * b_pad * (D_IN * D_HID + D_HID * D_OUT)
    bytes_accessed = 4 * (b_pad * (D_IN + D_OUT)
                          + D_HID * D_IN + D_HID + D_OUT * D_HID + D_OUT
                          + nc * 8 * 128)

    out = pl.pallas_call(
        kernel,
        out_shape=jax.ShapeDtypeStruct((nc * 8, 128), jnp.float32),
        grid_spec=pltpu.PrefetchScalarGridSpec(
            num_scalar_prefetch=0,
            grid=(nc, ntpc),
            in_specs=[
                pl.BlockSpec((D_IN, tm), lambda c, i: (0, c * ntpc + i)),    # x^T tile
                pl.BlockSpec((D_OUT, tm), lambda c, i: (0, c * ntpc + i)),   # t^T tile
                pl.BlockSpec((D_HID, D_IN), lambda c, i: (0, 0)),            # w1^T (resident)
                pl.BlockSpec((D_HID, 1), lambda c, i: (0, 0)),               # b1   (resident)
                pl.BlockSpec((D_OUT, D_HID), lambda c, i: (0, 0)),           # w2^T (resident)
                pl.BlockSpec((D_OUT, 1), lambda c, i: (0, 0)),               # b2   (resident)
            ],
            out_specs=pl.BlockSpec((8, 128), lambda c, i: (c, 0)),           # per-core partial
            scratch_shapes=[pltpu.VMEM((D_OUT, 1), jnp.float32)],
        ),
        compiler_params=pltpu.CompilerParams(
            # Batch-split axis is independent per core -> "parallel" (sharded on v7x megacore);
            # inner batch-tile axis is a reduction into the scratch accumulator -> "arbitrary".
            dimension_semantics=("parallel", "arbitrary"),
        ),
        cost_estimate=pl.CostEstimate(flops=flops, transcendentals=0,
                                      bytes_accessed=bytes_accessed),
    )(xT, tT, w1t, b1c, w2t, b2c)

    partials = out.reshape(nc, 8, 128)[:, 0, 0]          # one scalar per core slice
    return jnp.sum(partials) * (1.0 / float(B * D_OUT))  # F.l1_loss 'mean' over B*D_OUT elems


if __name__ == "__main__":
    key = jax.random.PRNGKey(0)
    kx, kt, kw1, kb1, kw2, kb2 = jax.random.split(key, 6)

    # Small demo shapes; B is deliberately NOT a multiple of the tile to exercise tail masking.
    B = 900
    # Producer emits feature-major (lane-dense) activations directly: x^T (20,B), t^T (10,B).
    xT = jax.random.normal(kx, (D_IN, B), dtype=jnp.float32)
    tT = jax.random.normal(kt, (D_OUT, B), dtype=jnp.float32)

    # nn.Linear-style init: U(-1/sqrt(fan_in), 1/sqrt(fan_in)); stored as (in, out).
    lim1 = 1.0 / (D_IN ** 0.5)
    lim2 = 1.0 / (D_HID ** 0.5)
    w1 = jax.random.uniform(kw1, (D_IN, D_HID), jnp.float32, -lim1, lim1)
    b1 = jax.random.uniform(kb1, (D_HID,), jnp.float32, -lim1, lim1)
    w2 = jax.random.uniform(kw2, (D_HID, D_OUT), jnp.float32, -lim2, lim2)
    b2 = jax.random.uniform(kb2, (D_OUT,), jnp.float32, -lim2, lim2)
    w1t, w2t = w1.T, w2.T   # one-time host-side weight transposes

    # Small-tile call: exercises multi-step accumulation, the 2-way core split, and tail masking.
    loss_small = jax.block_until_ready(
        model_with_l1_loss(xT, tT, w1t, b1, w2t, b2, tm=256))
    # Default large-tile call (single step per core at this small batch).
    loss_big = jax.block_until_ready(
        model_with_l1_loss(xT, tT, w1t, b1, w2t, b2))

    # Pure-JAX reference (batch-major math, identical semantics).
    x, t = xT.T, tT.T
    y_ref = jnp.maximum(x @ w1 + b1, 0.0) @ w2 + b2
    loss_ref = jnp.mean(jnp.abs(y_ref - t))
    assert jnp.allclose(loss_small, loss_ref, rtol=1e-4, atol=1e-5), (loss_small, loss_ref)
    assert jnp.allclose(loss_big, loss_ref, rtol=1e-4, atol=1e-5), (loss_big, loss_ref)

    # TODO(synk): ppe.reporting.report (metric logging side-effect) has no Pallas equivalent; omitted.
    print("KERNEL_OK")
</pallas_src>

<mosaic_0001>
module attributes {stable_mosaic.version = 11 : i64} {
  func.func @_mlp_l1_kernel(%arg0: i32, %arg1: i32, %arg2: memref<20x256xf32, #tpu.memory_space<vmem>>, %arg3: memref<10x256xf32, #tpu.memory_space<vmem>>, %arg4: memref<15x20xf32, #tpu.memory_space<vmem>>, %arg5: memref<15x1xf32, #tpu.memory_space<vmem>>, %arg6: memref<10x15xf32, #tpu.memory_space<vmem>>, %arg7: memref<10x1xf32, #tpu.memory_space<vmem>>, %arg8: memref<8x128xf32, #tpu.memory_space<vmem>>, %arg9: memref<10x1xf32, #tpu.memory_space<vmem>>) attributes {dimension_semantics = [#tpu.dimension_semantics<parallel>, #tpu.dimension_semantics<arbitrary>], iteration_bounds = array<i64: 2, 2>, scalar_prefetch = 0 : i64, scratch_operands = 1 : i64, tpu.core_type = #tpu.core_type<tc>, window_params = [{transform_indices = @transform_0, window_bounds = array<i64: 20, 256>}, {transform_indices = @transform_1, window_bounds = array<i64: 10, 256>}, {pipeline_mode = #tpu.pipeline_mode<synchronous>, transform_indices = @transform_2, window_bounds = array<i64: 15, 20>}, {pipeline_mode = #tpu.pipeline_mode<synchronous>, transform_indices = @transform_3, window_bounds = array<i64: 15, 1>}, {pipeline_mode = #tpu.pipeline_mode<synchronous>, transform_indices = @transform_4, window_bounds = array<i64: 10, 15>}, {pipeline_mode = #tpu.pipeline_mode<synchronous>, transform_indices = @transform_5, window_bounds = array<i64: 10, 1>}, {transform_indices = @transform_6, window_bounds = array<i64: 8, 128>}]} {
    %c0_i32 = arith.constant 0 : i32
    %0 = arith.cmpi eq, %arg1, %c0_i32 : i32
    %1 = arith.extui %0 : i1 to i32
    %c0_i32_0 = arith.constant 0 : i32
    %2 = arith.cmpi ne, %1, %c0_i32_0 : i32
    scf.if %2 {
      %cst_21 = arith.constant 0.000000e+00 : f32
      %39 = vector.broadcast %cst_21 : f32 to vector<10x1xf32>
      %c0_22 = arith.constant 0 : index
      %c0_23 = arith.constant 0 : index
      %40 = vector.load %arg9[%c0_22, %c0_23] : memref<10x1xf32, #tpu.memory_space<vmem>>, vector<10x1xf32>
      tpu.vector_store %arg9[%c0_22, %c0_23], %39 {strides = array<i32>} : memref<10x1xf32, #tpu.memory_space<vmem>>, vector<10x1xf32>,
    } else {
    }
    %c0 = arith.constant 0 : index
    %c0_1 = arith.constant 0 : index
    %3 = vector.load %arg2[%c0, %c0_1] : memref<20x256xf32, #tpu.memory_space<vmem>>, vector<20x256xf32>
    %c0_2 = arith.constant 0 : index
    %c0_3 = arith.constant 0 : index
    %4 = vector.load %arg4[%c0_2, %c0_3] : memref<15x20xf32, #tpu.memory_space<vmem>>, vector<15x20xf32>
    %cst = arith.constant dense<0.000000e+00> : vector<15x256xf32>
    %5 = tpu.matmul %4, %3, %cst {dimension_numbers = #tpu.dot_dimension_numbers<[1], [0], [0], [1], [0, 0, 1, 1], [], []>} : vector<15x20xf32>, vector<20x256xf32>, vector<15x256xf32> -> vector<15x256xf32>
    %c0_4 = arith.constant 0 : index
    %c0_5 = arith.constant 0 : index
    %6 = vector.load %arg5[%c0_4, %c0_5] : memref<15x1xf32, #tpu.memory_space<vmem>>, vector<15x1xf32>
    %7 = vector.broadcast %6 : vector<15x1xf32> to vector<15x256xf32>
    %8 = arith.addf %5, %7 : vector<15x256xf32>
    %cst_6 = arith.constant 0.000000e+00 : f32
    %9 = vector.broadcast %cst_6 : f32 to vector<15x256xf32>
    %10 = arith.maximumf %8, %9 : vector<15x256xf32>
    %c0_7 = arith.constant 0 : index
    %c0_8 = arith.constant 0 : index
    %11 = vector.load %arg6[%c0_7, %c0_8] : memref<10x15xf32, #tpu.memory_space<vmem>>, vector<10x15xf32>
    %cst_9 = arith.constant dense<0.000000e+00> : vector<10x256xf32>
    %12 = tpu.matmul %11, %10, %cst_9 {dimension_numbers = #tpu.dot_dimension_numbers<[1], [0], [0], [1], [0, 0, 1, 1], [], []>} : vector<10x15xf32>, vector<15x256xf32>, vector<10x256xf32> -> vector<10x256xf32>
    %c0_10 = arith.constant 0 : index
    %c0_11 = arith.constant 0 : index
    %13 = vector.load %arg7[%c0_10, %c0_11] : memref<10x1xf32, #tpu.memory_space<vmem>>, vector<10x1xf32>
    %14 = vector.broadcast %13 : vector<10x1xf32> to vector<10x256xf32>
    %15 = arith.addf %12, %14 : vector<10x256xf32>
    %c0_12 = arith.constant 0 : index
    %c0_13 = arith.constant 0 : index
    %16 = vector.load %arg3[%c0_12, %c0_13] : memref<10x256xf32, #tpu.memory_space<vmem>>, vector<10x256xf32>
    %17 = arith.subf %15, %16 : vector<10x256xf32>
    %18 = math.absf %17 : vector<10x256xf32>
    %c2_i32 = arith.constant 2 : i32
    %19 = arith.muli %arg0, %c2_i32 : i32
    %20 = arith.addi %19, %arg1 : i32
    %c256_i32 = arith.constant 256 : i32
    %21 = arith.muli %20, %c256_i32 : i32
    %22 = tpu.iota {dimensions = array<i32: 1>} : vector<1x256xi32>
    %23 = vector.broadcast %21 : i32 to vector<1x256xi32>
    %24 = arith.addi %22, %23 : vector<1x256xi32>
    %c900_i32 = arith.constant 900 : i32
    %25 = vector.broadcast %c900_i32 : i32 to vector<1x256xi32>
    %26 = arith.cmpi slt, %24, %25 : vector<1x256xi32>
    %cst_14 = arith.constant 0.000000e+00 : f32
    %27 = vector.shape_cast %26 : vector<1x256xi1> to vector<1x256xi1>
    %28 = vector.broadcast %27 : vector<1x256xi1> to vector<10x256xi1>
    %29 = vector.broadcast %cst_14 : f32 to vector<10x256xf32>
    %30 = arith.select %28, %18, %29 : vector<10x256xi1>, vector<10x256xf32>
    %c0_15 = arith.constant 0 : index
    %c0_16 = arith.constant 0 : index
    %31 = vector.load %arg9[%c0_15, %c0_16] : memref<10x1xf32, #tpu.memory_space<vmem>>, vector<10x1xf32>
    %cst_17 = arith.constant dense<0.000000e+00> : vector<10xf32>
    %32 = vector.multi_reduction <add>, %30, %cst_17 [1] : vector<10x256xf32> to vector<10xf32>
    %33 = vector.shape_cast %32 : vector<10xf32> to vector<10x1xf32>
    %34 = arith.addf %31, %33 : vector<10x1xf32>
    %c0_18 = arith.constant 0 : index
    %c0_19 = arith.constant 0 : index
    %35 = vector.load %arg9[%c0_18, %c0_19] : memref<10x1xf32, #tpu.memory_space<vmem>>, vector<10x1xf32>
    tpu.vector_store %arg9[%c0_18, %c0_19], %34 {strides = array<i32>} : memref<10x1xf32, #tpu.memory_space<vmem>>, vector<10x1xf32>,
    %c1_i32 = arith.constant 1 : i32
    %36 = arith.cmpi eq, %arg1, %c1_i32 : i32
    %37 = arith.extui %36 : i1 to i32
    %c0_i32_20 = arith.constant 0 : i32
    %38 = arith.cmpi ne, %37, %c0_i32_20 : i32
    scf.if %38 {
      %c0_21 = arith.constant 0 : index
      %c0_22 = arith.constant 0 : index
      %39 = vector.load %arg9[%c0_21, %c0_22] : memref<10x1xf32, #tpu.memory_space<vmem>>, vector<10x1xf32>
      %40 = vector.shape_cast %39 : vector<10x1xf32> to vector<1x10x1xf32>
      %cst_23 = arith.constant dense<0.000000e+00> : vector<1xf32>
      %41 = vector.multi_reduction <add>, %40, %cst_23 [1, 2] : vector<1x10x1xf32> to vector<1xf32>
      %42 = vector.shape_cast %41 : vector<1xf32> to vector<1x1x1xf32>
      %43 = vector.extract %42[0, 0, 0] : f32 from vector<1x1x1xf32>
      %cst_24 = arith.constant 0.000000e+00 : f32
      %44 = vector.broadcast %cst_24 : f32 to vector<8x128xf32>
      %45 = vector.broadcast %43 : f32 to vector<8x128xf32>
      %46 = arith.addf %44, %45 : vector<8x128xf32>
      %c0_25 = arith.constant 0 : index
      %c0_26 = arith.constant 0 : index
      %47 = vector.load %arg8[%c0_25, %c0_26] : memref<8x128xf32, #tpu.memory_space<vmem>>, vector<8x128xf32>
      tpu.vector_store %arg8[%c0_25, %c0_26], %46 {strides = array<i32>} : memref<8x128xf32, #tpu.memory_space<vmem>>, vector<8x128xf32>,
    } else {
    }
    return
  }
  func.func @transform_0(%arg0: i32, %arg1: i32) -> (i32, i32) {
    %c2_i32 = arith.constant 2 : i32
    %0 = arith.muli %arg0, %c2_i32 : i32
    %1 = arith.addi %0, %arg1 : i32
    %c0_i32 = arith.constant 0 : i32
    %c0_i32_0 = arith.constant 0 : i32
    return %c0_i32, %1 : i32, i32
  }
  func.func @transform_1(%arg0: i32, %arg1: i32) -> (i32, i32) {
    %c2_i32 = arith.constant 2 : i32
    %0 = arith.muli %arg0, %c2_i32 : i32
    %1 = arith.addi %0, %arg1 : i32
    %c0_i32 = arith.constant 0 : i32
    %c0_i32_0 = arith.constant 0 : i32
    return %c0_i32, %1 : i32, i32
  }
  func.func @transform_2(%arg0: i32, %arg1: i32) -> (i32, i32) {
    %c0_i32 = arith.constant 0 : i32
    %c0_i32_0 = arith.constant 0 : i32
    %c0_i32_1 = arith.constant 0 : i32
    return %c0_i32, %c0_i32_0 : i32, i32
  }
  func.func @transform_3(%arg0: i32, %arg1: i32) -> (i32, i32) {
    %c0_i32 = arith.constant 0 : i32
    %c0_i32_0 = arith.constant 0 : i32
    %c0_i32_1 = arith.constant 0 : i32
    return %c0_i32, %c0_i32_0 : i32, i32
  }
  func.func @transform_4(%arg0: i32, %arg1: i32) -> (i32, i32) {
    %c0_i32 = arith.constant 0 : i32
    %c0_i32_0 = arith.constant 0 : i32
    %c0_i32_1 = arith.constant 0 : i32
    return %c0_i32, %c0_i32_0 : i32, i32
  }
  func.func @transform_5(%arg0: i32, %arg1: i32) -> (i32, i32) {
    %c0_i32 = arith.constant 0 : i32
    %c0_i32_0 = arith.constant 0 : i32
    %c0_i32_1 = arith.constant 0 : i32
    return %c0_i32, %c0_i32_0 : i32, i32
  }
  func.func @transform_6(%arg0: i32, %arg1: i32) -> (i32, i32) {
    %c0_i32 = arith.constant 0 : i32
    %c0_i32_0 = arith.constant 0 : i32
    return %arg0, %c0_i32 : i32, i32
  }
}

</mosaic_0001>

<bundles_post_ra>
// kernel: tpu_custom_call.1
= control target key start
LH: loop header
LB: loop body
LE: loop exit
PB: predicated region body
PF: predicated region fallthrough
CT: control target
= control target key end

     0   :  { %s1331_s0 = inlined_call_operand.hbm [shape: f32[20,1024], index: 0, kind: input, shape index: {}]   ;;  %s1332_s1 = inlined_call_operand.hbm [shape: f32[10,1024], index: 1, kind: input, shape index: {}]   ;;  %s1333_s2 = inlined_call_operand.vmem [shape: f32[15,20], index: 2, kind: input, shape index: {}]   ;;  %s1334_s3 = inlined_call_operand.vmem [shape: f32[15,1], index: 3, kind: input, shape index: {}]   ;;  %s1335_s4 = inlined_call_operand.vmem [shape: f32[10,15], index: 4, kind: input, shape index: {}]   ;;  %s1336_s5 = inlined_call_operand.vmem [shape: f32[10,1], index: 5, kind: input, shape index: {}]   ;;  %s1337_s6 = inlined_call_operand.hbm [shape: f32[16,128], index: 6, kind: output, shape index: {}]  }
   0x1   :  { %1346 = sst [smem:[#allocation21_spill]] %s1331_s0 }
   0x2   :  { %1347 = sst [smem:[#allocation22_spill]] %s1337_s6 }
   0x3   :  { %11 = vsyncpa [#allocation4], 0 }
   0x4   :  { %13 = vsyncpa [#allocation4 + $0x1], 0 }
   0x5   :  { %14 = vsyncpa [#allocation7], 0 }
   0x6   :  { %16 = vsyncpa [#allocation7 + $0x1], 0 }
   0x7   :  { %17 = vsyncpa [#allocation5], 0 }
   0x8   :  { %19 = vsyncpa [#allocation5 + $0x1], 0  ;;  %s1089_s21 = smov 0   ;;  %s1091_s22 = smov 0  }
   0x9   :  { %s1093_s23 = smov 0   ;;  %s1095_s24 = smov 0  }
   0xa   :  { %s1097_s25 = smov 0   ;;  %s1099_s26 = smov 0  }
   0xb   :  { %s1101_s27 = smov 0   ;;  %s1103_s28 = smov 0  }
   0xc   :  { %s1105_s29 = smov 0   ;;  %s1107_s30 = smov 0  }
   0xd   :  { %s1109_s7 = smov 0  }
   0xe LB: > { %1348 = sst [smem:[#allocation12_spill]] %s1015_s23  ;;  %s703_s8 = sadd.s32 4294967295, %s1047_s7   ;;  %s1047_s7 = sphi %s1109_s7, %s25_s7   ;;  %s1043_s30 = sphi %s1107_s30, %s1373_s30   ;;  %s1039_s29 = sphi %s1105_s29, %s1378_s29   ;;  %s1035_s28 = sphi %s1103_s28, %s1371_s28   ;;  %s1031_s27 = sphi %s1101_s27, %s1370_s27   ;;  %s1027_s26 = sphi %s1099_s26, %s1369_s26   ;;  %s1023_s25 = sphi %s1097_s25, %s1377_s25   ;;  %s1019_s24 = sphi %s1095_s24, %s1376_s24   ;;  %s1015_s23 = sphi %s1093_s23, %s1367_s23   ;;  %s1011_s22 = sphi %s1091_s22, %s1375_s22   ;;  %s1007_s21 = sphi %s1089_s21, %s1374_s21  }
   0xf   : > { %1349 = sst [smem:[#allocation13_spill]] %s1027_s26  ;;  %s34_s10 = sadd.s32 1, %s1039_s29 }
  0x10   : > { %1350 = sst [smem:[#allocation14_spill]] %s1039_s29  ;;  %s37_s11 = sadd.s32 1, %s1043_s30 }
  0x11   : > { %1351 = sst [smem:[#allocation15_spill]] %s1043_s30  ;;  %p35_p0 = scmp.ge.s32.totalorder %s34_s10, 2 }
  0x12   : > { %s705_s12 = sshll.u32 %s1043_s30, 1  ;;  %s48_s14 = sadd.s32 1, %s1027_s26 }
  0x13   : > { %s1148_s13 = sadd.s32 %s1039_s29, %s705_s12  ;;  %s1380_s10 = smov (%p35_p0, %s34_s10), 0 }
  0x14   : > { %1352 = sst [smem:[#allocation16_spill]] %s1380_s10  ;;  %s1382_s11 = smov (!%p35_p0, %s37_s11), %s1043_s30 }
  0x15   : > { %p55_p1 = scmp.ne.s32.totalorder %s1027_s26, %s1023_s25  ;;  %p56_p2 = scmp.eq.s32.totalorder %s1047_s7, 0 }
  0x16   : > { %p39_p3 = scmp.ge.s32.totalorder %s1382_s11, 2  ;;  %p61_p4 = scmp.ne.s32.totalorder %s1023_s25, %s1019_s24 }
  0x17   : > { %p1158_p5 = por %p56_p2, %p55_p1  ;;  %p62_p6 = scmp.eq.s32.totalorder %s703_s8, 0 }
  0x18   : > { %s1384_s11 = smov (%p39_p3, %s1382_s11), 0  ;;  %s188_s17 = sadd.s32 1, %s1015_s23 }
  0x19   : > { %1354 = sst [smem:[#allocation17_spill]] %s1384_s11  ;;  %p1164_p7 = por %p62_p6, %p61_p4 }
  0x1a   : > { %s706_s18 = sshll.u32 %s1384_s11, 1  ;;  %s185_s19 = ssub.s32 %s1043_s30, %s1384_s11 }
  0x1b   : > { %s44_s20 = sadd.s32 %s706_s18, %s1380_s10  ;;  %p186_p8 = scmp.eq.s32.totalorder %s185_s19, 0 }
  0x1c   : > { %s45_s24 = ssub.s32 %s1148_s13, %s44_s20  ;;  %p198_p9 = scmp.ne.s32.totalorder %s1015_s23, %s1011_s22 }
  0x1d   : > { %p46_p10 = scmp.eq.s32.totalorder %s45_s24, 0  ;;  %p199_p11 = scmp.eq.s32.totalorder %s703_s8, 3 }
  0x1e   : > { %s1177_s12 = scalar_select %p186_p8, %s1015_s23, %s188_s17  }
  0x1f   : > { %s1180_s9 = scalar_select %p46_p10, %s1027_s26, %s48_s14  }
  0x20   : > { %1356 = sst [smem:[#allocation18_spill]] %s1177_s12  ;;  %p1182_p12 = por %p199_p11, %p198_p9 }
  0x21   : > { %1357 = sst [smem:[#allocation19_spill]] %s1180_s9  ;;  %p204_p13 = scmp.ne.s32.totalorder %s1011_s22, %s1007_s21 }
  0x22   : > { %s1359_s6 = sadd.s32 4294967294, %s1047_s7   ;;  %p764_p1 = scmp.lt.s32.totalorder %s1047_s7, 4 }
  0x23   : > { %p205_p0 = scmp.eq.s32.totalorder %s1359_s6, 3  ;;  %s1192_s18 = sand.u32 1, %s1027_s26  }
  0x24   : > { %s743_s8 = smul.u32 48, %s1192_s18  ;;  %s741_s14 = sshll.u32 %s1148_s13, 4 }
  0x25   : > { %p1194_p2 = por %p205_p0, %p204_p13  ;;  %s1362_s0 = sld [smem:[#allocation21_spill]] }
  0x26   : > { %p1205_p3 = pnand %p764_p1, %p1158_p5  ;;  %s241_s10 = scalar_lea.vmem [#allocation3], %s743_s8 }
  0x27   : > { %s1360_s19 = scalar_select %p1194_p2, 1, 0 }
  0x28   : > { %s251_s30 = sshll.u32 %s241_s10, 4  ;;  %p718_p4 = scmp.ge.s32.totalorder %s1047_s7, 1  ;;  %s252_s30 = int_to_ptr.vmem [resolvable:$true] %s251_s30 }
  0x29   : > { %1361 = sst [smem:[#allocation20_spill]] %s1360_s19  ;;  %s238_s9 = scalar_lea.sflag [#allocation4], %s1192_s18 }
  0x2a   : > { %s1049_s13 = smov 1024   ;;  %s1050_s26 = smov 256  }
  0x2b   : > { %s248_s24 = scalar_lea.hbm %s1362_s0, %s741_s14  ;;  %s1051_s12 = smov 16  }
  0x2c   : > { %s249_s11 = sshll.u32 %s248_s24, 4  ;;  %p283_p6 = scmp.lt.s32.totalorder %s1047_s7, 5  ;;  %s250_s11 = int_to_ptr.hbm [resolvable:$true] %s249_s11 }
  0x2d   : > { %756 = dma.hbm_to_vmem [thread:$0]  (!%p1205_p3), %s250_s11, 768, %s252_s30, %s238_s9, %s1049_s13, %s1050_s26, %s1051_s12  }
  0x2e   : > { %s714_s15 = sshll.u32 %s1192_s18, 5  ;;  %s272_s0 = scalar_lea.hbm %s1332_s1, %s741_s14 }
  0x2f   : > { %p284_p5 = pnand %p718_p4, %p283_p6  ;;  %s273_s24 = sshll.u32 %s272_s0, 4  ;;  %s274_s24 = int_to_ptr.hbm [resolvable:$true] %s273_s24 }
  0x30   : > { %s265_s8 = scalar_lea.vmem [#allocation6], %s714_s15  ;;  %s262_s23 = scalar_lea.sflag [#allocation7], %s1192_s18 }
  0x31   : > { %s275_s10 = sshll.u32 %s265_s8, 4  ;;  %287 = sbr.rel (%p284_p5) target bundleno = 695 (0x2b7), region = 44  ;;  %s276_s10 = int_to_ptr.vmem [resolvable:$true] %s275_s10 }
  0x32   : > { %759 = dma.hbm_to_vmem [thread:$0]  (!%p1205_p3), %s274_s24, 512, %s276_s10, %s262_s23, %s1049_s13, %s1050_s26, %s1051_s12  }
  0x33   : > { %s289_s19 = sand.u32 (!%p284_p5), 1, %s1023_s25  }
  0x34   : > { %s744_s30 = smul.u32 (!%p284_p5), 48, %s289_s19  ;;  %s290_s9 = scalar_lea.sflag (!%p284_p5), [#allocation4], %s289_s19 }
  0x36   : > { %s293_s11 = scalar_lea.vmem [#allocation3], %s744_s30 }
  0x37   : > { %994 = dma.done.wait (%p1164_p7), %s290_s9, 768  }
  0x38   : > { %996 = vsyncadd (%p1164_p7), %s290_s9, 4294966528  ;;  %s719_s0 = sshll.u32 %s289_s19, 5  ;;  %s300_s14 = scalar_lea.sflag [#allocation7], %s289_s19 }
  0x39   : > { %s1226_s15 = scalar_lea.vmem [#allocation6], %s719_s0 }
  0x3a   : > { %998 = dma.done.wait (%p1164_p7), %s300_s14, 512  }
  0x3b   : > { %1000 = vsyncadd (%p1164_p7), %s300_s14, 4294966784  ;;  %s335_s23 = sand.u32 1, %s1011_s22   ;;  %p721_p8 = scmp.ne.s32.totalorder %s1031_s27, 0 }
  0x3c   : > { %s1235_s26 = sshll.u32 %s335_s23, 3 }
  0x3d   : > { %s337_s12 = scalar_lea.vmem [#allocation8], %s1235_s26  ;;  %347 = sbr.rel (%p721_p8) target bundleno = 69 (0x45), region = 56 }
  0x42   : > { %vm348_vm0 = vcmask 7168   ;;  %vm350_vm1 = vcmask 1024   ;;  %v1052_v0 = vmov 0.0  }
  0x43   : > { %349 = vst.msk [vmem:[#allocation2] sm:$0xff] %vm348_vm0, %v1052_v0 }
  0x44   : > { %351 = vst.msk [vmem:[#allocation2 + $0x8] sm:$0x3] %vm350_vm1, %v1052_v0 }
  0x45 PF: > { %v356_v1 = vld [vmem:[%s293_s11 + $0x20] sm:$0xf]  ;;  %vm379_vm2 = vcmask 1043456   ;;  %v357_v2 = vld [vmem:[%s293_s11 + $0x28] sm:$0xf]  ;;  %v354_v3 = vld [vmem:[%s293_s11 + $0x10] sm:$0xff]  ;;  %v525_v30 = vlaneseq }
  0x46   : > { %722 = vmatpush.msk.msra.mxu0 %vm379_vm2, %v356_v1  ;;  %725 = vmatpush.msk.msra.mxu1 %vm379_vm2, %v357_v2  ;;  %v355_v4 = vld [vmem:[%s293_s11 + $0x18] sm:$0xff]  ;;  %v352_v5 = vld [vmem:[%s293_s11] sm:$0xff]  ;;  %v353_v6 = vld [vmem:[%s293_s11 + $0x8] sm:$0xff]  ;;  %v1053_v7 = vmov 0   ;;  %vm372_vm3 = vcmask 162816   ;;  %vm457_vm4 = vcmask 1046528  }
  0x47   : > { %859 = vset.pattern.permute.xlu0 %v1053_v7  ;;  %v361_v8 = vld [vmem:[%s1334_s3 + $0x8] sm:$0x7f]  ;;  %860 = vset.pattern.permute.xlu1 %v1053_v7  ;;  %v358_v9 = vld [vmem:[%s1333_s2] sm:$0xff]  ;;  %vm450_vm5 = vcmask 121856   ;;  %s734_s18 = sshll.u32 %s1035_s28, 1  ;;  %v526_v32 = vand.u32 127, %v525_v30 }
  0x48   : > { %400 = vmatpush.msra.mxu0 %v354_v3  ;;  %423 = vmatpush.msra.mxu1 %v355_v4  ;;  %v360_v10 = vld [vmem:[%s1334_s3] sm:$0xff]  ;;  %v359_v11 = vld [vmem:[%s1333_s2 + $0x8] sm:$0x7f]  ;;  %s523_s19 = sadd.s32 %s1031_s27, %s734_s18  ;;  %v510_v37 = vld [vmem:[%s1226_s15] sm:$0xff]  ;;  %vm546_vm8 = vcmask 1041408   ;;  %vm554_vm9 = vcmask 7168  }
  0x49   : > { %369 = vperm.xlu0 %859, %v361_v8   ;;  %v439_v12 = vld [vmem:[%s1336_s5 + $0x8] sm:$0x3]  ;;  %v438_v13 = vld [vmem:[%s1336_s5] sm:$0xff]  ;;  %s735_s6 = sshll.u32 %s523_s19, 8  ;;  %v527_v33 = vadd.s32 128, %v526_v32  ;;  %v511_v39 = vld [vmem:[%s1226_s15 + $0x8] sm:$0xff] }
  0x4a   : > { %401 = vmatpush.msra.mxu0 %v352_v5  ;;  %424 = vmatpush.msra.mxu1 %v353_v6  ;;  %v436_v28 = vld [vmem:[%s1335_s4] sm:$0xff]  ;;  %v437_v29 = vld [vmem:[%s1335_s4 + $0x8] sm:$0x3]  ;;  %v528_v34 = vstv %s735_s6  ;;  %vm556_vm10 = vcmask 1024   ;;  %p736_p7 = scmp.ne.s32.totalorder %s1031_s27, 1 }
  0x4b   : > { %723 = vmatmul.msk.f32.vlgmr.msra.gmra.mxu0 %vm372_vm3, %v358_v9  ;;  %726 = vmatmul.msk.f32.vlgmr.msra.gmra.mxu1 %vm372_vm3, %v358_v9  ;;  %v529_v40 = vadd.s32 %v528_v34, %v526_v32  ;;  %v530_v41 = vadd.s32 %v528_v34, %v527_v33  ;;  %v512_v51 = vld [vmem:[%s1226_s15 + $0x10] sm:$0x3]  ;;  %v513_v53 = vld [vmem:[%s1226_s15 + $0x18] sm:$0x3] }
  0x4c   : > { %447 = vperm.xlu1 %860, %v439_v12   ;;  %v541_v2 = vld [vmem:[#allocation2] sm:$0xff]  ;;  %v542_v5 = vld [vmem:[#allocation2 + $0x8] sm:$0x3] }
  0x4d   : > { %vm531_vm6 = vcmp.lt.s32.totalorder %v529_v40, 900  ;;  %vm532_vm7 = vcmp.lt.s32.totalorder %v530_v41, 900 }
  0x51   : > { %364 = vperm.xlu0 %859, %v360_v10  }
  0x53   : > { %724 = vmatmul.msk.f32.gmra.mxu0 %vm372_vm3, %v359_v11  ;;  %727 = vmatmul.msk.f32.gmra.mxu1 %vm372_vm3, %v359_v11 }
  0x54   : > { %442 = vperm.xlu1 %860, %v438_v13  }
  0xbb   : > { %v370_v14 = vpop.permute.xlu0 %369 }
  0xbe   : > { %v448_v31 = vpop.permute.xlu1 %447 }
  0xc3   : > { %v365_v17 = vpop.permute.xlu0 %364 }
  0xc6   : > { %v443_v35 = vpop.permute.xlu1 %442 }
  0xc8   : > { %v403_v15 = vpop.f32.mrf.mxu0  ;;  %v426_v16 = vpop.f32.mrf.mxu1 }
  0xc9   : > { %v404_v20 = vadd.f32 %v403_v15, %v365_v17  ;;  %v427_v21 = vadd.f32 %v426_v16, %v365_v17 }
  0xcb   : > { %v432_v26 = vmax.f32 %v404_v20, 0.0  ;;  %v433_v27 = vmax.f32 %v427_v21, 0.0 }
  0xd0   : > { %v406_v18 = vpop.f32.mrf.mxu0  ;;  %v429_v19 = vpop.f32.mrf.mxu1 }
  0xd1   : > { %v407_v22 = vadd.f32 %v406_v18, %v370_v14  ;;  %v430_v23 = vadd.f32 %v429_v19, %v370_v14 }
  0xd3   : > { %v434_v24 = vmax.f32 %v407_v22, 0.0  ;;  %v435_v25 = vmax.f32 %v430_v23, 0.0 }
  0xd5   : > { %728 = vmatpush.msk.msra.mxu2 %vm457_vm4, %v434_v24  ;;  %731 = vmatpush.msk.msra.mxu3 %vm457_vm4, %v435_v25 }
  0xd7   : > { %479 = vmatpush.msra.mxu2 %v432_v26  ;;  %502 = vmatpush.msra.mxu3 %v433_v27 }
  0xd8   : > { %729 = vmatmul.msk.f32.vlgmr.msra.gmra.mxu2 %vm450_vm5, %v436_v28  ;;  %732 = vmatmul.msk.f32.vlgmr.msra.gmra.mxu3 %vm450_vm5, %v436_v28 }
  0xe0   : > { %730 = vmatmul.msk.f32.gmra.mxu2 %vm450_vm5, %v437_v29  ;;  %733 = vmatmul.msk.f32.gmra.mxu3 %vm450_vm5, %v437_v29 }
 0x15b   : > { %v481_v36 = vpop.f32.mrf.mxu2  ;;  %v504_v38 = vpop.f32.mrf.mxu3 }
 0x15c   : > { %v482_v42 = vadd.f32 %v481_v36, %v443_v35  ;;  %v505_v43 = vadd.f32 %v504_v38, %v443_v35 }
 0x15e   : > { %v514_v44 = vsub.f32 %v482_v42, %v510_v37  ;;  %v515_v45 = vsub.f32 %v505_v43, %v511_v39 }
 0x160   : > { %v518_v46 = vand.u32 2147483647, %v514_v44  ;;  %v519_v47 = vand.u32 2147483647, %v515_v45 }
 0x162   : > { %v537_v48 = vsel %vm531_vm6, %v518_v46, 0.0  ;;  %v538_v49 = vsel %vm532_vm7, %v519_v47, 0.0 }
 0x163   : > { %v484_v50 = vpop.f32.mrf.mxu2  ;;  %v507_v52 = vpop.f32.mrf.mxu3  ;;  %v543_v54 = vadd.f32 %v538_v49, %v537_v48 }
 0x164   : > { %v485_v55 = vadd.f32 %v484_v50, %v448_v31  ;;  %v508_v56 = vadd.f32 %v507_v52, %v448_v31 }
 0x165   : > { %544 = vadd.xlane.f32.xlu2 %v543_v54 }
 0x166   : > { %v516_v57 = vsub.f32 %v485_v55, %v512_v51  ;;  %v517_v58 = vsub.f32 %v508_v56, %v513_v53 }
 0x168   : > { %v520_v59 = vand.u32 2147483647, %v516_v57  ;;  %v521_v60 = vand.u32 2147483647, %v517_v58 }
 0x16a   : > { %v539_v61 = vsel %vm531_vm6, %v520_v59, 0.0  ;;  %v540_v62 = vsel %vm532_vm7, %v521_v60, 0.0 }
 0x16b   : > { %v547_v63 = vsel %vm546_vm8, %v539_v61, 0.0  ;;  %v548_v0 = vsel %vm546_vm8, %v540_v62, 0.0 }
 0x16c   : > { %v549_v1 = vadd.f32 %v548_v0, %v547_v63 }
 0x16e   : > { %550 = vadd.xlane.f32.xlu2 %v549_v1 }
 0x1d8   : > { %v545_v3 = vpop.xlane.xlu2 %544 }
 0x1d9   : > { %v552_v4 = vadd.f32 %v545_v3, %v541_v2 }
 0x1db   : > { %555 = vst.msk [vmem:[#allocation2] sm:$0xff] %vm554_vm9, %v552_v4 }
 0x1e0   : > { %561 = sbr.rel (%p736_p7) target bundleno = 675 (0x2a3), region = 60 }
 0x1e1   : > { %v551_v6 = vpop.xlane.xlu2 %550 }
 0x1e2   : > { %v553_v7 = vadd.f32 %v551_v6, %v542_v5 }
 0x1e4   : > { %557 = vst.msk [vmem:[#allocation2 + $0x8] sm:$0x3] %vm556_vm10, %v553_v7 }
 0x1e5   : > { %v562_v8 = vld [vmem:[#allocation2] sm:$0xff] }
 0x1e6   : > { %v564_v10 = vsel %vm554_vm9, %v562_v8, 0.0 }
 0x1eb   : > { %v563_v9 = vld [vmem:[#allocation2 + $0x8] sm:$0x3] }
 0x1ec   : > { %v565_v11 = vsel %vm556_vm10, %v563_v9, 0.0 }
 0x1ed   : > { %v566_v12 = vadd.f32 %v565_v11, %v564_v10 }
 0x1ef   : > { %567 = vadd.xlane.f32.xlu0 %v566_v12 }
 0x262   : > { %v568_v13 = vpop.xlane.xlu0 %567 }
 0x263   : > { %v569_v14 = vrot.slane %v568_v13, 4 }
 0x265   : > { %v570_v15 = vadd.f32 %v569_v14, %v568_v13 }
 0x267   : > { %v571_v16 = vrot.slane %v570_v15, 2 }
 0x269   : > { %v572_v17 = vadd.f32 %v571_v16, %v570_v15 }
 0x26b   : > { %v573_v18 = vrot.slane %v572_v17, 1 }
 0x26d   : > { %v574_v19 = vadd.f32 %v573_v18, %v572_v17 }
 0x26f   : > { %745 = vpush %v574_v19 }
 0x2a0   : > { %s746_s15 = spop %745 }
 0x2a1   : > { %v576_v20 = vstv %s746_s15 }
 0x2a2   : > { %578 = vst [vmem:[%s337_s12] sm:$0xff] %v576_v20 }
 0x2a3 PF: > { %s738_s27 = sshll.u32 %s1035_s28, 3  ;;  %s1364_s20 = sld [smem:[#allocation22_spill]] }
 0x2a4   : > { %s592_s8 = sshll.u32 %s337_s12, 4  ;;  %s580_s30 = scalar_lea.sflag [#allocation5], %s335_s23  ;;  %s593_s8 = int_to_ptr.vmem [resolvable:$true] %s592_s8 }
 0x2a9   : > { %s590_s24 = scalar_lea.hbm %s1364_s20, %s738_s27  ;;  %s941_s14 = scalar_lea.hbm %s1364_s20, 16 }
 0x2aa   : > { %s594_s10 = sshll.u32 %s590_s24, 4  ;;  %s595_s10 = int_to_ptr.hbm [resolvable:$true] %s594_s10 }
 0x2ab   : > { %s935_s9 = sshra.s32 %s595_s10, 4  ;;  %s936_s9 = int_to_ptr.hbm [resolvable:$true] %s935_s9 }
 0x2ac   : > { %s937_s11 = scalar_lea.hbm %s936_s9, 8  ;;  %p942_p13 = scmp.lt.s32.totalorder %s936_s9, %s1364_s20 }
 0x2ad   : > { %p938_p9 = scmp.ne.s32.totalorder %s936_s9, %s937_s11  ;;  %p943_p0 = scmp.lt.s32.totalorder %s941_s14, %s937_s11 }
 0x2af   : > { %p939_p10 = pnand %p938_p9, %p1182_p12  ;;  %p944_p1 = por %p943_p0, %p942_p13 }
 0x2b1   : > { %p940_p11 = pneg %p939_p10 }
 0x2b3   : > { %p945_p3 = pnand %p944_p1, %p940_p11 }
 0x2b5   : > { %948 = shalt.err (!%p945_p3)
}
 0x2b6   : > { %751 = dma.vmem_to_hbm [thread:$0]  (%p1182_p12), %s593_s8, 128, %s595_s10, %s580_s30  }
 0x2b7 PF: > { %p765_p4 = scmp.ge.s32.totalorder %s1047_s7, 2  ;;  %s606_s26 = sand.u32 1, %s1007_s21  }
 0x2b8   : > { %s607_s12 = scalar_lea.sflag [#allocation5], %s606_s26 }
 0x2b9   : > { %p761_p6 = pnand %p765_p4, %p1194_p2 }
 0x2bb   : > { %p762_p5 = pneg %p761_p6 }
 0x2bd   : > { %1002 = dma.done.wait (%p762_p5), %s607_s12, 128  }
 0x2be   : > { %1004 = vsyncadd (%p762_p5), %s607_s12, 4294967168  ;;  %s25_s7 = sadd.s32 1, %s1047_s7   ;;  %s1366_s19 = sld [smem:[#allocation12_spill]] }
 0x2bf   : > { %p22_p8 = scmp.ge.s32.totalorder %s25_s7, 6   ;;  %s1367_s23 = sld [smem:[#allocation18_spill]] }
 0x2c0   : > { %s1368_s29 = sld [smem:[#allocation13_spill]]  ;;  %s1374_s21 = smov %s1011_s22 }
 0x2c1   : > { %s1369_s26 = sld [smem:[#allocation19_spill]]  ;;  %s1376_s24 = smov %s1023_s25 }
 0x2c2   : > { %s1370_s27 = sld [smem:[#allocation14_spill]] }
 0x2c3   : > { %s1371_s28 = sld [smem:[#allocation15_spill]] }
 0x2c4   : > { %s1372_s6 = sld [smem:[#allocation16_spill]]  ;;  %s1375_s22 = smov %s1366_s19 }
 0x2c5   : > { %s1373_s30 = sld [smem:[#allocation17_spill]] }
 0x2c6   : > { %s1377_s25 = smov %s1368_s29  ;;  %24 = sbr.rel (!%p22_p8) target bundleno = 14 (0xe), region = 110 }
 0x2ca   : > { %s1378_s29 = smov %s1372_s6 }
 0x2cb   :  { %613 = vsyncpa [#allocation4], 1 }
 0x2cc   :  { %615 = vsyncpa [#allocation4 + $0x1], 1 }
 0x2cd   :  { %616 = vsyncpa [#allocation7], 1 }
 0x2ce   :  { %618 = vsyncpa [#allocation7 + $0x1], 1 }
 0x2cf   :  { %619 = vsyncpa [#allocation5], 1 }
 0x2d0   :  { %621 = vsyncpa [#allocation5 + $0x1], 1 }

</bundles_post_ra>
